<compile_context>
chip_gen: v6e
topology: v6e:2x2x1
jax: 0.10.0
libtpu: 0.0.40
codegen_flags: <defaults>
</compile_context>

<pallas_src>
import functools

import jax
import jax.numpy as jnp
from jax.experimental import pallas as pl
from jax.experimental.pallas import tpu as pltpu

EPS = 1e-5
LANE = 128
_VMEM_BUDGET = 36 * 1024 * 1024        # conservative tile budget (v5e/v6e/v7x)
_DEFAULT_VMEM_LIMIT = 48 * 1024 * 1024  # < 64 MiB physical on v7x


def _round_up(v, m):
    return (v + m - 1) // m * m


def _resblock_kernel(has_bias, inv_dout, *refs):
    if has_bias:
        (x_ref, w1_ref, b1_ref, w2_ref, b2_ref, w3_ref, b3_ref,
         lnw_ref, lnb_ref, o_ref) = refs
    else:
        x_ref, w1_ref, w2_ref, w3_ref, lnw_ref, o_ref = refs

    x = x_ref[...]                                 # native dtype (bf16 stays bf16)

    # fc1 (+bias) + ReLU -- MXU in native dtype, f32 accumulate.
    h = jnp.dot(x, w1_ref[...], preferred_element_type=jnp.float32)
    if has_bias:
        h = h + b1_ref[...].astype(jnp.float32)
    h = jnp.maximum(h, 0.0)

    # fc2 -- cast h back to the operand dtype so the MXU runs at native rate.
    out = jnp.dot(h.astype(x.dtype), w2_ref[...],
                  preferred_element_type=jnp.float32)
    if has_bias:
        out = out + b2_ref[...].astype(jnp.float32)

    # TODO(synk): dropout is identity (inference mode); training-mode dropout
    # would draw a mask via pltpu.prng_seed / pltpu.prng_random_bits.

    # fc3 residual branch.
    res = jnp.dot(x, w3_ref[...], preferred_element_type=jnp.float32)
    if has_bias:
        res = res + b3_ref[...].astype(jnp.float32)

    y = out + res                                  # (bm, d_out_p) f32

    # LayerNorm over the REAL d_out lanes.  Padded lanes of y are exactly 0
    # (zero-padded weights / biases), so the sums over all lanes equal the
    # sums over the real lanes; divide by the real d_out (inv_dout).
    s = jnp.sum(y, axis=-1, keepdims=True)
    ss = jnp.sum(y * y, axis=-1, keepdims=True)
    mean = s * inv_dout
    var = jnp.maximum(ss * inv_dout - mean * mean, 0.0)
    y = (y - mean) * jax.lax.rsqrt(var + EPS)
    y = y * lnw_ref[...].astype(jnp.float32)       # padded lanes of ln_w are 0
    if has_bias:
        y = y + lnb_ref[...].astype(jnp.float32)

    o_ref[...] = y.astype(o_ref.dtype)


def res_block(x, w1, w2, w3, ln_w,
              b1=None, b2=None, b3=None, ln_b=None,
              *, block_rows=1024, lane_multiple=LANE,
              vmem_limit_bytes=None, single_buffer_weights=True):
    """Fused ResBlock forward.

    Weights are in (in, out) layout (PyTorch linear.weight.T); biases are 1-D
    or None (all-or-nothing, matching the module's `bias` flag).  x may have
    any leading shape; the last dim is input_dim.
    """
    orig_shape = x.shape
    d_in = orig_shape[-1]
    d_hid = w1.shape[1]
    d_out = w2.shape[1]
    has_bias = b1 is not None

    rows = 1
    for s in orig_shape[:-1]:
        rows *= s
    x2 = x.reshape(rows, d_in)

    # ---- lane-dense padding of hidden / output feature dims (exact). -------
    d_hid_p = _round_up(d_hid, lane_multiple)
    d_out_p = _round_up(d_out, lane_multiple)

    def pad_cols(a, n):
        return a if a.shape[-1] == n else jnp.pad(a, ((0, 0), (0, n - a.shape[-1])))

    def pad_vec(a, n):
        return a if a.shape[0] == n else jnp.pad(a, (0, n - a.shape[0]))

    w1p = pad_cols(w1, d_hid_p)
    w2p = jnp.pad(w2, ((0, d_hid_p - d_hid), (0, d_out_p - d_out)))
    w3p = pad_cols(w3, d_out_p)
    lnw_p = pad_vec(ln_w, d_out_p).reshape(1, d_out_p)
    if has_bias:
        b1p = pad_vec(b1, d_hid_p).reshape(1, d_hid_p)
        b2p = pad_vec(b2, d_out_p).reshape(1, d_out_p)
        b3p = pad_vec(b3, d_out_p).reshape(1, d_out_p)
        lnb_p = pad_vec(ln_b, d_out_p).reshape(1, d_out_p)

    x_bytes = jnp.dtype(x.dtype).itemsize
    w_bytes = jnp.dtype(w1.dtype).itemsize
    weight_bytes = (d_in * d_hid_p + d_hid_p * d_out_p + d_in * d_out_p) * w_bytes
    weight_bytes += (d_hid_p + 4 * d_out_p) * w_bytes   # biases + LN params

    # ---- row-tile selection -------------------------------------------------
    # TODO(synk): for very large d_hid (v7x 64 MiB VMEM) add a second grid axis
    # tiling d_hid (fc1 N-tile / fc2 K-tile with an f32 accumulator scratch).
    per_row = 2 * (d_in + d_out_p) * x_bytes + (d_hid_p + 3 * d_out_p) * 4
    avail = _VMEM_BUDGET - weight_bytes
    bm_fit = max(8, (avail // per_row) // 8 * 8) if avail > per_row * 8 else 8
    bm = min(_round_up(block_rows, 8), bm_fit, _round_up(rows, 8))
    if rows > 8:  # guarantee >= 2 grid steps: v7x megacore + DMA/compute overlap
        bm = min(bm, max(8, _round_up(pl.cdiv(rows, 2), 8)))
    bm = max(8, (bm // 8) * 8)
    grid = (pl.cdiv(rows, bm),)

    limit = vmem_limit_bytes if vmem_limit_bytes is not None else _DEFAULT_VMEM_LIMIT

    def make_call(use_buffered):
        def const_spec(shape):
            idx = lambda i: (0, 0)
            if use_buffered:
                try:
                    return pl.BlockSpec(shape, idx, pipeline_mode=pl.Buffered(1))
                except TypeError:  # older jax without pipeline_mode kwarg
                    pass
            return pl.BlockSpec(shape, idx)

        row_spec = pl.BlockSpec((bm, d_in), lambda i: (i, 0))
        out_spec = pl.BlockSpec((bm, d_out_p), lambda i: (i, 0))

        inputs = [x2, w1p]
        in_specs = [row_spec, const_spec((d_in, d_hid_p))]
        if has_bias:
            inputs.append(b1p); in_specs.append(const_spec((1, d_hid_p)))
        inputs.append(w2p); in_specs.append(const_spec((d_hid_p, d_out_p)))
        if has_bias:
            inputs.append(b2p); in_specs.append(const_spec((1, d_out_p)))
        inputs.append(w3p); in_specs.append(const_spec((d_in, d_out_p)))
        if has_bias:
            inputs.append(b3p); in_specs.append(const_spec((1, d_out_p)))
        inputs.append(lnw_p); in_specs.append(const_spec((1, d_out_p)))
        if has_bias:
            inputs.append(lnb_p); in_specs.append(const_spec((1, d_out_p)))

        flops = (2 * rows * (d_in * d_hid_p + d_hid_p * d_out_p + d_in * d_out_p)
                 + 10 * rows * d_out_p)
        bytes_accessed = (rows * d_in * x_bytes + weight_bytes
                          + rows * d_out_p * x_bytes)
        cost = pl.CostEstimate(flops=flops, transcendentals=rows,
                               bytes_accessed=bytes_accessed)

        call = pl.pallas_call(
            functools.partial(_resblock_kernel, has_bias, 1.0 / float(d_out)),
            out_shape=jax.ShapeDtypeStruct((rows, d_out_p), x.dtype),
            grid_spec=pltpu.PrefetchScalarGridSpec(
                num_scalar_prefetch=0,
                grid=grid,
                in_specs=in_specs,
                out_specs=out_spec,
            ),
            compiler_params=pltpu.CompilerParams(
                dimension_semantics=("parallel",),
                vmem_limit_bytes=limit,
            ),
            cost_estimate=cost,
        )
        return call, inputs

    call, inputs = make_call(single_buffer_weights)
    try:
        out = call(*inputs)
    except Exception:
        if not single_buffer_weights:
            raise
        # Fallback for jax versions where Buffered(1) pipeline_mode is rejected.
        call, inputs = make_call(False)
        out = call(*inputs)

    if d_out_p != d_out:
        out = out[:, :d_out]
    return out.reshape(orig_shape[:-1] + (d_out,))


if __name__ == "__main__":
    # Small shapes implied by the module: (batch, seq, input_dim) tokens.
    batch, seq = 2, 8
    input_dim, hidden_dim, output_dim = 32, 64, 32

    key = jax.random.PRNGKey(0)
    ks = jax.random.split(key, 7)
    scale = 0.1
    x = jax.random.normal(ks[0], (batch, seq, input_dim), dtype=jnp.float32)
    w1 = jax.random.normal(ks[1], (input_dim, hidden_dim), jnp.float32) * scale
    b1 = jax.random.normal(ks[2], (hidden_dim,), jnp.float32) * scale
    w2 = jax.random.normal(ks[3], (hidden_dim, output_dim), jnp.float32) * scale
    b2 = jax.random.normal(ks[4], (output_dim,), jnp.float32) * scale
    w3 = jax.random.normal(ks[5], (input_dim, output_dim), jnp.float32) * scale
    b3 = jax.random.normal(ks[6], (output_dim,), jnp.float32) * scale
    # LayerNorm params as initialized by the module: ones / zeros.
    ln_w = jnp.ones((output_dim,), jnp.float32)
    ln_b = jnp.zeros((output_dim,), jnp.float32)

    def reference(x, w1, w2, w3, ln_w, b1, b2, b3, ln_b):
        x2 = x.reshape(-1, x.shape[-1])
        h = x2 @ w1 + (b1 if b1 is not None else 0.0)
        h = jnp.maximum(h, 0.0)
        y = h @ w2 + (b2 if b2 is not None else 0.0)
        y = y + x2 @ w3 + (b3 if b3 is not None else 0.0)
        mean = jnp.mean(y, axis=-1, keepdims=True)
        var = jnp.mean((y - mean) ** 2, axis=-1, keepdims=True)
        y = (y - mean) * jax.lax.rsqrt(var + EPS) * ln_w
        if ln_b is not None:
            y = y + ln_b
        return y.reshape(x.shape[:-1] + (w2.shape[1],))

    # bias=True variant
    out = res_block(x, w1, w2, w3, ln_w, b1, b2, b3, ln_b)
    out = jax.block_until_ready(out)
    ref = reference(x, w1, w2, w3, ln_w, b1, b2, b3, ln_b)
    assert out.shape == (batch, seq, output_dim)
    err = float(jnp.max(jnp.abs(out - ref)))
    assert err < 2e-2, f"max abs err {err}"

    # bias=False variant (module's bias flag off: no fc / LN biases)
    out_nb = res_block(x, w1, w2, w3, ln_w)
    out_nb = jax.block_until_ready(out_nb)
    ref_nb = reference(x, w1, w2, w3, ln_w, None, None, None, None)
    err_nb = float(jnp.max(jnp.abs(out_nb - ref_nb)))
    assert err_nb < 2e-2, f"max abs err (no bias) {err_nb}"

    print("KERNEL_OK")
</pallas_src>

<mosaic_0001>
module attributes {stable_mosaic.version = 11 : i64} {
  func.func @_resblock_kernel(%arg0: i32, %arg1: memref<8x32xf32, #tpu.memory_space<vmem>>, %arg2: memref<32x128xf32, #tpu.memory_space<vmem>>, %arg3: memref<1x128xf32, #tpu.memory_space<vmem>>, %arg4: memref<128x128xf32, #tpu.memory_space<vmem>>, %arg5: memref<1x128xf32, #tpu.memory_space<vmem>>, %arg6: memref<32x128xf32, #tpu.memory_space<vmem>>, %arg7: memref<1x128xf32, #tpu.memory_space<vmem>>, %arg8: memref<1x128xf32, #tpu.memory_space<vmem>>, %arg9: memref<1x128xf32, #tpu.memory_space<vmem>>, %arg10: memref<8x128xf32, #tpu.memory_space<vmem>>) attributes {dimension_semantics = [#tpu.dimension_semantics<parallel>], iteration_bounds = array<i64: 2>, scalar_prefetch = 0 : i64, scratch_operands = 0 : i64, tpu.core_type = #tpu.core_type<tc>, window_params = [{transform_indices = @transform_0, window_bounds = array<i64: 8, 32>}, {pipeline_mode = #tpu.pipeline_mode<synchronous>, transform_indices = @transform_1, window_bounds = array<i64: 32, 128>}, {pipeline_mode = #tpu.pipeline_mode<synchronous>, transform_indices = @transform_2, window_bounds = array<i64: 1, 128>}, {pipeline_mode = #tpu.pipeline_mode<synchronous>, transform_indices = @transform_3, window_bounds = array<i64: 128, 128>}, {pipeline_mode = #tpu.pipeline_mode<synchronous>, transform_indices = @transform_4, window_bounds = array<i64: 1, 128>}, {pipeline_mode = #tpu.pipeline_mode<synchronous>, transform_indices = @transform_5, window_bounds = array<i64: 32, 128>}, {pipeline_mode = #tpu.pipeline_mode<synchronous>, transform_indices = @transform_6, window_bounds = array<i64: 1, 128>}, {pipeline_mode = #tpu.pipeline_mode<synchronous>, transform_indices = @transform_7, window_bounds = array<i64: 1, 128>}, {pipeline_mode = #tpu.pipeline_mode<synchronous>, transform_indices = @transform_8, window_bounds = array<i64: 1, 128>}, {transform_indices = @transform_9, window_bounds = array<i64: 8, 128>}]} {
    %c0 = arith.constant 0 : index
    %c0_0 = arith.constant 0 : index
    %0 = vector.load %arg1[%c0, %c0_0] : memref<8x32xf32, #tpu.memory_space<vmem>>, vector<8x32xf32>
    %c0_1 = arith.constant 0 : index
    %c0_2 = arith.constant 0 : index
    %1 = vector.load %arg2[%c0_1, %c0_2] : memref<32x128xf32, #tpu.memory_space<vmem>>, vector<32x128xf32>
    %cst = arith.constant dense<0.000000e+00> : vector<8x128xf32>
    %2 = tpu.matmul %0, %1, %cst {dimension_numbers = #tpu.dot_dimension_numbers<[1], [0], [0], [1], [0, 0, 1, 1], [], []>} : vector<8x32xf32>, vector<32x128xf32>, vector<8x128xf32> -> vector<8x128xf32>
    %c0_3 = arith.constant 0 : index
    %c0_4 = arith.constant 0 : index
    %3 = vector.load %arg3[%c0_3, %c0_4] : memref<1x128xf32, #tpu.memory_space<vmem>>, vector<1x128xf32>
    %4 = vector.broadcast %3 : vector<1x128xf32> to vector<8x128xf32>
    %5 = arith.addf %2, %4 : vector<8x128xf32>
    %cst_5 = arith.constant 0.000000e+00 : f32
    %6 = vector.broadcast %cst_5 : f32 to vector<8x128xf32>
    %7 = arith.maximumf %5, %6 : vector<8x128xf32>
    %c0_6 = arith.constant 0 : index
    %c0_7 = arith.constant 0 : index
    %8 = vector.load %arg4[%c0_6, %c0_7] : memref<128x128xf32, #tpu.memory_space<vmem>>, vector<128x128xf32>
    %cst_8 = arith.constant dense<0.000000e+00> : vector<8x128xf32>
    %9 = tpu.matmul %7, %8, %cst_8 {dimension_numbers = #tpu.dot_dimension_numbers<[1], [0], [0], [1], [0, 0, 1, 1], [], []>} : vector<8x128xf32>, vector<128x128xf32>, vector<8x128xf32> -> vector<8x128xf32>
    %c0_9 = arith.constant 0 : index
    %c0_10 = arith.constant 0 : index
    %10 = vector.load %arg5[%c0_9, %c0_10] : memref<1x128xf32, #tpu.memory_space<vmem>>, vector<1x128xf32>
    %11 = vector.broadcast %10 : vector<1x128xf32> to vector<8x128xf32>
    %12 = arith.addf %9, %11 : vector<8x128xf32>
    %c0_11 = arith.constant 0 : index
    %c0_12 = arith.constant 0 : index
    %13 = vector.load %arg6[%c0_11, %c0_12] : memref<32x128xf32, #tpu.memory_space<vmem>>, vector<32x128xf32>
    %cst_13 = arith.constant dense<0.000000e+00> : vector<8x128xf32>
    %14 = tpu.matmul %0, %13, %cst_13 {dimension_numbers = #tpu.dot_dimension_numbers<[1], [0], [0], [1], [0, 0, 1, 1], [], []>} : vector<8x32xf32>, vector<32x128xf32>, vector<8x128xf32> -> vector<8x128xf32>
    %c0_14 = arith.constant 0 : index
    %c0_15 = arith.constant 0 : index
    %15 = vector.load %arg7[%c0_14, %c0_15] : memref<1x128xf32, #tpu.memory_space<vmem>>, vector<1x128xf32>
    %16 = vector.broadcast %15 : vector<1x128xf32> to vector<8x128xf32>
    %17 = arith.addf %14, %16 : vector<8x128xf32>
    %18 = arith.addf %12, %17 : vector<8x128xf32>
    %cst_16 = arith.constant dense<0.000000e+00> : vector<8xf32>
    %19 = vector.multi_reduction <add>, %18, %cst_16 [1] : vector<8x128xf32> to vector<8xf32>
    %20 = vector.shape_cast %19 : vector<8xf32> to vector<8x1xf32>
    %21 = arith.mulf %18, %18 : vector<8x128xf32>
    %cst_17 = arith.constant dense<0.000000e+00> : vector<8xf32>
    %22 = vector.multi_reduction <add>, %21, %cst_17 [1] : vector<8x128xf32> to vector<8xf32>
    %23 = vector.shape_cast %22 : vector<8xf32> to vector<8x1xf32>
    %cst_18 = arith.constant 3.125000e-02 : f32
    %24 = vector.broadcast %cst_18 : f32 to vector<8x1xf32>
    %25 = arith.mulf %20, %24 : vector<8x1xf32>
    %cst_19 = arith.constant 3.125000e-02 : f32
    %26 = vector.broadcast %cst_19 : f32 to vector<8x1xf32>
    %27 = arith.mulf %23, %26 : vector<8x1xf32>
    %28 = arith.mulf %25, %25 : vector<8x1xf32>
    %29 = arith.subf %27, %28 : vector<8x1xf32>
    %cst_20 = arith.constant 0.000000e+00 : f32
    %30 = vector.broadcast %cst_20 : f32 to vector<8x1xf32>
    %31 = arith.maximumf %29, %30 : vector<8x1xf32>
    %32 = vector.broadcast %25 : vector<8x1xf32> to vector<8x128xf32>
    %33 = arith.subf %18, %32 : vector<8x128xf32>
    %cst_21 = arith.constant 9.99999974E-6 : f32
    %34 = vector.broadcast %cst_21 : f32 to vector<8x1xf32>
    %35 = arith.addf %31, %34 : vector<8x1xf32>
    %36 = math.rsqrt %35 : vector<8x1xf32>
    %37 = vector.broadcast %36 : vector<8x1xf32> to vector<8x128xf32>
    %38 = arith.mulf %33, %37 : vector<8x128xf32>
    %c0_22 = arith.constant 0 : index
    %c0_23 = arith.constant 0 : index
    %39 = vector.load %arg8[%c0_22, %c0_23] : memref<1x128xf32, #tpu.memory_space<vmem>>, vector<1x128xf32>
    %40 = vector.broadcast %39 : vector<1x128xf32> to vector<8x128xf32>
    %41 = arith.mulf %38, %40 : vector<8x128xf32>
    %c0_24 = arith.constant 0 : index
    %c0_25 = arith.constant 0 : index
    %42 = vector.load %arg9[%c0_24, %c0_25] : memref<1x128xf32, #tpu.memory_space<vmem>>, vector<1x128xf32>
    %43 = vector.broadcast %42 : vector<1x128xf32> to vector<8x128xf32>
    %44 = arith.addf %41, %43 : vector<8x128xf32>
    %c0_26 = arith.constant 0 : index
    %c0_27 = arith.constant 0 : index
    %45 = vector.load %arg10[%c0_26, %c0_27] : memref<8x128xf32, #tpu.memory_space<vmem>>, vector<8x128xf32>
    tpu.vector_store %arg10[%c0_26, %c0_27], %44 {strides = array<i32>} : memref<8x128xf32, #tpu.memory_space<vmem>>, vector<8x128xf32>,
    return
  }
  func.func @transform_0(%arg0: i32) -> (i32, i32) {
    %c0_i32 = arith.constant 0 : i32
    %c0_i32_0 = arith.constant 0 : i32
    return %arg0, %c0_i32 : i32, i32
  }
  func.func @transform_1(%arg0: i32) -> (i32, i32) {
    %c0_i32 = arith.constant 0 : i32
    %c0_i32_0 = arith.constant 0 : i32
    %c0_i32_1 = arith.constant 0 : i32
    return %c0_i32, %c0_i32_0 : i32, i32
  }
  func.func @transform_2(%arg0: i32) -> (i32, i32) {
    %c0_i32 = arith.constant 0 : i32
    %c0_i32_0 = arith.constant 0 : i32
    %c0_i32_1 = arith.constant 0 : i32
    return %c0_i32, %c0_i32_0 : i32, i32
  }
  func.func @transform_3(%arg0: i32) -> (i32, i32) {
    %c0_i32 = arith.constant 0 : i32
    %c0_i32_0 = arith.constant 0 : i32
    %c0_i32_1 = arith.constant 0 : i32
    return %c0_i32, %c0_i32_0 : i32, i32
  }
  func.func @transform_4(%arg0: i32) -> (i32, i32) {
    %c0_i32 = arith.constant 0 : i32
    %c0_i32_0 = arith.constant 0 : i32
    %c0_i32_1 = arith.constant 0 : i32
    return %c0_i32, %c0_i32_0 : i32, i32
  }
  func.func @transform_5(%arg0: i32) -> (i32, i32) {
    %c0_i32 = arith.constant 0 : i32
    %c0_i32_0 = arith.constant 0 : i32
    %c0_i32_1 = arith.constant 0 : i32
    return %c0_i32, %c0_i32_0 : i32, i32
  }
  func.func @transform_6(%arg0: i32) -> (i32, i32) {
    %c0_i32 = arith.constant 0 : i32
    %c0_i32_0 = arith.constant 0 : i32
    %c0_i32_1 = arith.constant 0 : i32
    return %c0_i32, %c0_i32_0 : i32, i32
  }
  func.func @transform_7(%arg0: i32) -> (i32, i32) {
    %c0_i32 = arith.constant 0 : i32
    %c0_i32_0 = arith.constant 0 : i32
    %c0_i32_1 = arith.constant 0 : i32
    return %c0_i32, %c0_i32_0 : i32, i32
  }
  func.func @transform_8(%arg0: i32) -> (i32, i32) {
    %c0_i32 = arith.constant 0 : i32
    %c0_i32_0 = arith.constant 0 : i32
    %c0_i32_1 = arith.constant 0 : i32
    return %c0_i32, %c0_i32_0 : i32, i32
  }
  func.func @transform_9(%arg0: i32) -> (i32, i32) {
    %c0_i32 = arith.constant 0 : i32
    %c0_i32_0 = arith.constant 0 : i32
    return %arg0, %c0_i32 : i32, i32
  }
}

module attributes {stable_mosaic.version = 11 : i64} {
  func.func @_resblock_kernel(%arg0: i32, %arg1: memref<8x32xf32, #tpu.memory_space<vmem>>, %arg2: memref<32x128xf32, #tpu.memory_space<vmem>>, %arg3: memref<1x128xf32, #tpu.memory_space<vmem>>, %arg4: memref<128x128xf32, #tpu.memory_space<vmem>>, %arg5: memref<1x128xf32, #tpu.memory_space<vmem>>, %arg6: memref<32x128xf32, #tpu.memory_space<vmem>>, %arg7: memref<1x128xf32, #tpu.memory_space<vmem>>, %arg8: memref<1x128xf32, #tpu.memory_space<vmem>>, %arg9: memref<1x128xf32, #tpu.memory_space<vmem>>, %arg10: memref<8x128xf32, #tpu.memory_space<vmem>>) attributes {dimension_semantics = [#tpu.dimension_semantics<parallel>], iteration_bounds = array<i64: 2>, scalar_prefetch = 0 : i64, scratch_operands = 0 : i64, tpu.core_type = #tpu.core_type<tc>, window_params = [{transform_indices = @transform_0, window_bounds = array<i64: 8, 32>}, {pipeline_mode = #tpu.pipeline_mode<synchronous>, transform_indices = @transform_1, window_bounds = array<i64: 32, 128>}, {pipeline_mode = #tpu.pipeline_mode<synchronous>, transform_indices = @transform_2, window_bounds = array<i64: 1, 128>}, {pipeline_mode = #tpu.pipeline_mode<synchronous>, transform_indices = @transform_3, window_bounds = array<i64: 128, 128>}, {pipeline_mode = #tpu.pipeline_mode<synchronous>, transform_indices = @transform_4, window_bounds = array<i64: 1, 128>}, {pipeline_mode = #tpu.pipeline_mode<synchronous>, transform_indices = @transform_5, window_bounds = array<i64: 32, 128>}, {pipeline_mode = #tpu.pipeline_mode<synchronous>, transform_indices = @transform_6, window_bounds = array<i64: 1, 128>}, {pipeline_mode = #tpu.pipeline_mode<synchronous>, transform_indices = @transform_7, window_bounds = array<i64: 1, 128>}, {pipeline_mode = #tpu.pipeline_mode<synchronous>, transform_indices = @transform_8, window_bounds = array<i64: 1, 128>}, {transform_indices = @transform_9, window_bounds = array<i64: 8, 128>}]} {
    %c0 = arith.constant 0 : index
    %c0_0 = arith.constant 0 : index
    %0 = vector.load %arg1[%c0, %c0_0] : memref<8x32xf32, #tpu.memory_space<vmem>>, vector<8x32xf32>
    %c0_1 = arith.constant 0 : index
    %c0_2 = arith.constant 0 : index
    %1 = vector.load %arg2[%c0_1, %c0_2] : memref<32x128xf32, #tpu.memory_space<vmem>>, vector<32x128xf32>
    %cst = arith.constant dense<0.000000e+00> : vector<8x128xf32>
    %2 = tpu.matmul %0, %1, %cst {dimension_numbers = #tpu.dot_dimension_numbers<[1], [0], [0], [1], [0, 0, 1, 1], [], []>} : vector<8x32xf32>, vector<32x128xf32>, vector<8x128xf32> -> vector<8x128xf32>
    %c0_3 = arith.constant 0 : index
    %c0_4 = arith.constant 0 : index
    %3 = vector.load %arg3[%c0_3, %c0_4] : memref<1x128xf32, #tpu.memory_space<vmem>>, vector<1x128xf32>
    %4 = vector.broadcast %3 : vector<1x128xf32> to vector<8x128xf32>
    %5 = arith.addf %2, %4 : vector<8x128xf32>
    %cst_5 = arith.constant 0.000000e+00 : f32
    %6 = vector.broadcast %cst_5 : f32 to vector<8x128xf32>
    %7 = arith.maximumf %5, %6 : vector<8x128xf32>
    %c0_6 = arith.constant 0 : index
    %c0_7 = arith.constant 0 : index
    %8 = vector.load %arg4[%c0_6, %c0_7] : memref<128x128xf32, #tpu.memory_space<vmem>>, vector<128x128xf32>
    %cst_8 = arith.constant dense<0.000000e+00> : vector<8x128xf32>
    %9 = tpu.matmul %7, %8, %cst_8 {dimension_numbers = #tpu.dot_dimension_numbers<[1], [0], [0], [1], [0, 0, 1, 1], [], []>} : vector<8x128xf32>, vector<128x128xf32>, vector<8x128xf32> -> vector<8x128xf32>
    %c0_9 = arith.constant 0 : index
    %c0_10 = arith.constant 0 : index
    %10 = vector.load %arg5[%c0_9, %c0_10] : memref<1x128xf32, #tpu.memory_space<vmem>>, vector<1x128xf32>
    %11 = vector.broadcast %10 : vector<1x128xf32> to vector<8x128xf32>
    %12 = arith.addf %9, %11 : vector<8x128xf32>
    %c0_11 = arith.constant 0 : index
    %c0_12 = arith.constant 0 : index
    %13 = vector.load %arg6[%c0_11, %c0_12] : memref<32x128xf32, #tpu.memory_space<vmem>>, vector<32x128xf32>
    %cst_13 = arith.constant dense<0.000000e+00> : vector<8x128xf32>
    %14 = tpu.matmul %0, %13, %cst_13 {dimension_numbers = #tpu.dot_dimension_numbers<[1], [0], [0], [1], [0, 0, 1, 1], [], []>} : vector<8x32xf32>, vector<32x128xf32>, vector<8x128xf32> -> vector<8x128xf32>
    %c0_14 = arith.constant 0 : index
    %c0_15 = arith.constant 0 : index
    %15 = vector.load %arg7[%c0_14, %c0_15] : memref<1x128xf32, #tpu.memory_space<vmem>>, vector<1x128xf32>
    %16 = vector.broadcast %15 : vector<1x128xf32> to vector<8x128xf32>
    %17 = arith.addf %14, %16 : vector<8x128xf32>
    %18 = arith.addf %12, %17 : vector<8x128xf32>
    %cst_16 = arith.constant dense<0.000000e+00> : vector<8xf32>
    %19 = vector.multi_reduction <add>, %18, %cst_16 [1] : vector<8x128xf32> to vector<8xf32>
    %20 = vector.shape_cast %19 : vector<8xf32> to vector<8x1xf32>
    %21 = arith.mulf %18, %18 : vector<8x128xf32>
    %cst_17 = arith.constant dense<0.000000e+00> : vector<8xf32>
    %22 = vector.multi_reduction <add>, %21, %cst_17 [1] : vector<8x128xf32> to vector<8xf32>
    %23 = vector.shape_cast %22 : vector<8xf32> to vector<8x1xf32>
    %cst_18 = arith.constant 3.125000e-02 : f32
    %24 = vector.broadcast %cst_18 : f32 to vector<8x1xf32>
    %25 = arith.mulf %20, %24 : vector<8x1xf32>
    %cst_19 = arith.constant 3.125000e-02 : f32
    %26 = vector.broadcast %cst_19 : f32 to vector<8x1xf32>
    %27 = arith.mulf %23, %26 : vector<8x1xf32>
    %28 = arith.mulf %25, %25 : vector<8x1xf32>
    %29 = arith.subf %27, %28 : vector<8x1xf32>
    %cst_20 = arith.constant 0.000000e+00 : f32
    %30 = vector.broadcast %cst_20 : f32 to vector<8x1xf32>
    %31 = arith.maximumf %29, %30 : vector<8x1xf32>
    %32 = vector.broadcast %25 : vector<8x1xf32> to vector<8x128xf32>
    %33 = arith.subf %18, %32 : vector<8x128xf32>
    %cst_21 = arith.constant 9.99999974E-6 : f32
    %34 = vector.broadcast %cst_21 : f32 to vector<8x1xf32>
    %35 = arith.addf %31, %34 : vector<8x1xf32>
    %36 = math.rsqrt %35 : vector<8x1xf32>
    %37 = vector.broadcast %36 : vector<8x1xf32> to vector<8x128xf32>
    %38 = arith.mulf %33, %37 : vector<8x128xf32>
    %c0_22 = arith.constant 0 : index
    %c0_23 = arith.constant 0 : index
    %39 = vector.load %arg8[%c0_22, %c0_23] : memref<1x128xf32, #tpu.memory_space<vmem>>, vector<1x128xf32>
    %40 = vector.broadcast %39 : vector<1x128xf32> to vector<8x128xf32>
    %41 = arith.mulf %38, %40 : vector<8x128xf32>
    %c0_24 = arith.constant 0 : index
    %c0_25 = arith.constant 0 : index
    %42 = vector.load %arg9[%c0_24, %c0_25] : memref<1x128xf32, #tpu.memory_space<vmem>>, vector<1x128xf32>
    %43 = vector.broadcast %42 : vector<1x128xf32> to vector<8x128xf32>
    %44 = arith.addf %41, %43 : vector<8x128xf32>
    %c0_26 = arith.constant 0 : index
    %c0_27 = arith.constant 0 : index
    %45 = vector.load %arg10[%c0_26, %c0_27] : memref<8x128xf32, #tpu.memory_space<vmem>>, vector<8x128xf32>
    tpu.vector_store %arg10[%c0_26, %c0_27], %44 {strides = array<i32>} : memref<8x128xf32, #tpu.memory_space<vmem>>, vector<8x128xf32>,
    return
  }
  func.func @transform_0(%arg0: i32) -> (i32, i32) {
    %c0_i32 = arith.constant 0 : i32
    %c0_i32_0 = arith.constant 0 : i32
    return %arg0, %c0_i32 : i32, i32
  }
  func.func @transform_1(%arg0: i32) -> (i32, i32) {
    %c0_i32 = arith.constant 0 : i32
    %c0_i32_0 = arith.constant 0 : i32
    %c0_i32_1 = arith.constant 0 : i32
    return %c0_i32, %c0_i32_0 : i32, i32
  }
  func.func @transform_2(%arg0: i32) -> (i32, i32) {
    %c0_i32 = arith.constant 0 : i32
    %c0_i32_0 = arith.constant 0 : i32
    %c0_i32_1 = arith.constant 0 : i32
    return %c0_i32, %c0_i32_0 : i32, i32
  }
  func.func @transform_3(%arg0: i32) -> (i32, i32) {
    %c0_i32 = arith.constant 0 : i32
    %c0_i32_0 = arith.constant 0 : i32
    %c0_i32_1 = arith.constant 0 : i32
    return %c0_i32, %c0_i32_0 : i32, i32
  }
  func.func @transform_4(%arg0: i32) -> (i32, i32) {
    %c0_i32 = arith.constant 0 : i32
    %c0_i32_0 = arith.constant 0 : i32
    %c0_i32_1 = arith.constant 0 : i32
    return %c0_i32, %c0_i32_0 : i32, i32
  }
  func.func @transform_5(%arg0: i32) -> (i32, i32) {
    %c0_i32 = arith.constant 0 : i32
    %c0_i32_0 = arith.constant 0 : i32
    %c0_i32_1 = arith.constant 0 : i32
    return %c0_i32, %c0_i32_0 : i32, i32
  }
  func.func @transform_6(%arg0: i32) -> (i32, i32) {
    %c0_i32 = arith.constant 0 : i32
    %c0_i32_0 = arith.constant 0 : i32
    %c0_i32_1 = arith.constant 0 : i32
    return %c0_i32, %c0_i32_0 : i32, i32
  }
  func.func @transform_7(%arg0: i32) -> (i32, i32) {
    %c0_i32 = arith.constant 0 : i32
    %c0_i32_0 = arith.constant 0 : i32
    %c0_i32_1 = arith.constant 0 : i32
    return %c0_i32, %c0_i32_0 : i32, i32
  }
  func.func @transform_8(%arg0: i32) -> (i32, i32) {
    %c0_i32 = arith.constant 0 : i32
    %c0_i32_0 = arith.constant 0 : i32
    %c0_i32_1 = arith.constant 0 : i32
    return %c0_i32, %c0_i32_0 : i32, i32
  }
  func.func @transform_9(%arg0: i32) -> (i32, i32) {
    %c0_i32 = arith.constant 0 : i32
    %c0_i32_0 = arith.constant 0 : i32
    return %arg0, %c0_i32 : i32, i32
  }
}

</mosaic_0001>

<bundles_post_ra>
// kernel: tpu_custom_call.1
= control target key start
LH: loop header
LB: loop body
LE: loop exit
PB: predicated region body
PF: predicated region fallthrough
CT: control target
= control target key end

     0   :  { %s1457_s0 = inlined_call_operand.hbm [shape: f32[16,32], index: 0, kind: input, shape index: {}]   ;;  %s1458_s1 = inlined_call_operand.hbm [shape: f32[32,128], index: 1, kind: input, shape index: {}]   ;;  %s1459_s2 = inlined_call_operand.vmem [shape: f32[1,128], index: 2, kind: input, shape index: {}]   ;;  %s1460_s3 = inlined_call_operand.hbm [shape: f32[128,128], index: 3, kind: input, shape index: {}]   ;;  %s1461_s4 = inlined_call_operand.vmem [shape: f32[1,128], index: 4, kind: input, shape index: {}]   ;;  %s1462_s5 = inlined_call_operand.hbm [shape: f32[32,128], index: 5, kind: input, shape index: {}]   ;;  %s1463_s6 = inlined_call_operand.vmem [shape: f32[1,128], index: 6, kind: input, shape index: {}]   ;;  %s1464_s7 = inlined_call_operand.vmem [shape: f32[1,128], index: 7, kind: input, shape index: {}]   ;;  %s1465_s8 = inlined_call_operand.vmem [shape: f32[1,128], index: 8, kind: input, shape index: {}]   ;;  %s1466_s9 = inlined_call_operand.hbm [shape: f32[16,128], index: 9, kind: output, shape index: {}]  }
   0x1   :  { %1471 = sst [smem:[#allocation16_spill]] %s1458_s1 }
   0x2   :  { %1472 = sst [smem:[#allocation17_spill]] %s1460_s3 }
   0x3   :  { %1473 = sst [smem:[#allocation18_spill]] %s1462_s5 }
   0x4   :  { %14 = vsyncpa [#allocation3], 0 }
   0x5   :  { %16 = vsyncpa [#allocation3 + $0x1], 0 }
   0x6   :  { %17 = vsyncpa [#allocation6], 0 }
   0x7   :  { %18 = vsyncpa [#allocation9], 0 }
   0x8   :  { %19 = vsyncpa [#allocation4], 0 }
   0x9   :  { %21 = vsyncpa [#allocation4 + $0x1], 0  ;;  %s1229_s30 = smov 0   ;;  %s1231_s10 = smov 0  }
   0xa   :  { %s1233_s11 = smov 0   ;;  %s1235_s12 = smov 0  }
   0xb LB: > { %s1250_s13 = sadd.s32 4294967295, %s1168_s12   ;;  %s798_s14 = sadd.s32 4294967294, %s1168_s12   ;;  %s1168_s12 = sphi %s1235_s12, %s1498_s12   ;;  %s1164_s11 = sphi %s1233_s11, %s1497_s11   ;;  %s1160_s10 = sphi %s1231_s10, %s1496_s10   ;;  %s1156_s30 = sphi %s1229_s30, %s1495_s30  }
   0xc   : > { %p47_p0 = scmp.ne.s32.totalorder %s1160_s10, %s1156_s30  ;;  %p1467_p1 = scmp.eq.s32.totalorder %s1250_s13, 0 }
   0xd   : > { %p245_p3 = scmp.eq.s32.totalorder %s798_s14, 1  ;;  %p799_p5 = scmp.ge.s32.totalorder %s1168_s12, 1 }
   0xe   : > { %p1259_p4 = por %p1467_p1, %p47_p0  ;;  %p252_p7 = scmp.lt.s32.totalorder %s1168_s12, 3 }
   0xf   : > { %p1264_p6 = por %p245_p3, %p47_p0  ;;  %s1170_s18 = smov [#allocation5]  }
  0x10   : > { %s1474_s15 = scalar_select %p1259_p4, 1, 0 }
  0x11   : > { %s1475_s16 = scalar_select %p1264_p6, 1, 0 }
  0x12   : > { %p1269_p8 = pnand %p799_p5, %p252_p7  ;;  %s264_s19 = sshll.u32 %s1170_s18, 4  ;;  %s265_s19 = int_to_ptr.vmem [resolvable:$true] %s264_s19 }
  0x13   : > { %s1171_s21 = smov [#allocation7]   ;;  %s1172_s23 = smov [#allocation8]  }
  0x14   : > { %s1476_s17 = scalar_select %p1269_p8, 1, 0 }
  0x15   : > { %p923_p9 = pneg %p1269_p8  ;;  %s280_s22 = sshll.u32 %s1171_s21, 4  ;;  %s281_s22 = int_to_ptr.vmem [resolvable:$true] %s280_s22 }
  0x16   : > { %s296_s24 = sshll.u32 %s1172_s23, 4  ;;  %s1001_s25 = scalar_lea.vmem %s265_s19, 512  ;;  %s297_s24 = int_to_ptr.vmem [resolvable:$true] %s296_s24 }
  0x17   : > { %p1278_p11 = pnand %p923_p9, %p1467_p1  ;;  %p1002_p13 = scmp.ne.s32.totalorder %s265_s19, %s1001_s25 }
  0x18   : > { %p1009_p5 = scmp.lt.s32.totalorder %s265_s19, %s265_s19  ;;  %p1010_p7 = scmp.lt.s32.totalorder %s1001_s25, %s1001_s25 }
  0x19   : > { %p992_p12 = pneg %p1278_p11 }
  0x1a   : > { %p1011_p9 = por %p1010_p7, %p1009_p5 }
  0x1b   : > { %p1004_p0 = pnand %p1002_p13, %p992_p12 }
  0x1d   : > { %p1005_p3 = pneg %p1004_p0 }
  0x1f   : > { %p1012_p10 = pnand %p1011_p9, %p1005_p3 }
  0x21   : > { %1015 = shalt.err (!%p1012_p10)
}
  0x22   : > { %s1173_s26 = smov 128   ;;  %s1174_s27 = smov 8  }
  0x23   : > { %s1478_s1 = sld [smem:[#allocation16_spill]]  ;;  %s1027_s14 = scalar_lea.vmem %s281_s22, 2048 }
  0x24   : > { %p1028_p1 = scmp.ne.s32.totalorder %s281_s22, %s1027_s14  ;;  %p1035_p2 = scmp.lt.s32.totalorder %s281_s22, %s281_s22 }
  0x25   : > { %p1036_p6 = scmp.lt.s32.totalorder %s1027_s14, %s1027_s14 }
  0x26   : > { %p1030_p13 = pnand %p1028_p1, %p992_p12 }
  0x27   : > { %p1037_p5 = por %p1036_p6, %p1035_p2 }
  0x28   : > { %p1031_p0 = pneg %p1030_p13 }
  0x29   : > { %926 = dma.hbm_to_vmem [thread:$0]  (!%p1278_p11), %s1478_s1, 512, %s265_s19, [#allocation6], %s1173_s26, %s1173_s26, %s1174_s27  }
  0x2a   : > { %p1038_p3 = pnand %p1037_p5, %p1031_p0 }
  0x2c   : > { %1041 = shalt.err (!%p1038_p3)
}
  0x2d   : > { %s1479_s3 = sld [smem:[#allocation17_spill]]  ;;  %s1053_s19 = scalar_lea.vmem %s297_s24, 512 }
  0x2e   : > { %p1054_p10 = scmp.ne.s32.totalorder %s297_s24, %s1053_s19  ;;  %p1061_p9 = scmp.lt.s32.totalorder %s297_s24, %s297_s24 }
  0x2f   : > { %p1062_p13 = scmp.lt.s32.totalorder %s1053_s19, %s1053_s19 }
  0x30   : > { %p1056_p7 = pnand %p1054_p10, %p992_p12 }
  0x31   : > { %p1063_p4 = por %p1062_p13, %p1061_p9 }
  0x32   : > { %p1057_p1 = pneg %p1056_p7 }
  0x33   : > { %929 = dma.hbm_to_vmem [thread:$0]  (!%p1278_p11), %s1479_s3, 2048, %s281_s22, [#allocation6], %s1173_s26, %s1173_s26, %s1174_s27  }
  0x34   : > { %p1064_p2 = pnand %p1063_p4, %p1057_p1 }
  0x36   : > { %1067 = shalt.err (!%p1064_p2)
}
  0x37   : > { %s1480_s5 = sld [smem:[#allocation18_spill]]  ;;  %s1309_s22 = sadd.s32 1, %s1168_s12  }
  0x38   : > { %s31_s28 = ssub.s32 %s1168_s12, %s1309_s22  ;;  %s34_s20 = sadd.s32 1, %s1164_s11 }
  0x39   : > { %p32_p4 = scmp.eq.s32.totalorder %s31_s28, 0  ;;  %p41_p6 = scmp.ne.s32.totalorder %s1164_s11, %s1160_s10 }
  0x3a   : > { %p42_p12 = scmp.eq.s32.totalorder %s1168_s12, 0  ;;  %p944_p0 = scmp.lt.s32.totalorder %s1168_s12, 2 }
  0x3b   : > { %s1319_s29 = scalar_select %p32_p4, %s1164_s11, %s34_s20  }
  0x3c   : > { %p43_p5 = por %p42_p12, %p41_p6  ;;  %p1482_p3 = scmp.eq.s32.totalorder %s1250_s13, 1 }
  0x3d   : > { %932 = dma.hbm_to_vmem [thread:$0]  (!%p1278_p11), %s1480_s5, 512, %s297_s24, [#allocation9], %s1173_s26, %s1173_s26, %s1174_s27  }
  0x3e   : > { %1481 = sst [smem:[#allocation15_spill]] %s1319_s29  ;;  %p1323_p10 = por %p1482_p3, %p41_p6 }
  0x3f   : > { %s319_s18 = sand.u32 1, %s1164_s11   ;;  %s805_s21 = sshll.u32 %s1168_s12, 7 }
  0x40   : > { %s1483_s14 = scalar_select %p1323_p10, 1, 0 }
  0x41   : > { %s804_s24 = sshll.u32 %s319_s18, 3  ;;  %s1332_s19 = scalar_lea.hbm %s1457_s0, %s805_s21 }
  0x42   : > { %s323_s23 = scalar_lea.vmem [#allocation2], %s804_s24  ;;  %p1334_p11 = pnand %p944_p0, %p43_p5 }
  0x43   : > { %s330_s25 = sshll.u32 %s323_s23, 4  ;;  %s320_s20 = scalar_lea.sflag [#allocation3], %s319_s18  ;;  %s331_s25 = int_to_ptr.vmem [resolvable:$true] %s330_s25 }
  0x44   : > { %s1068_s1 = scalar_lea.hbm %s1332_s19, 128  ;;  %p1070_p1 = pneg %p1334_p11 }
  0x45   : > { %p1069_p7 = scmp.ne.s32.totalorder %s1332_s19, %s1068_s1  ;;  %s1073_s27 = scalar_lea.hbm %s1457_s0, 256 }
  0x46   : > { %p1074_p2 = scmp.lt.s32.totalorder %s1332_s19, %s1457_s0  ;;  %p1075_p4 = scmp.lt.s32.totalorder %s1073_s27, %s1068_s1 }
  0x47   : > { %p1071_p9 = pnand %p1070_p1, %p1069_p7 }
  0x48   : > { %p1076_p6 = por %p1075_p4, %p1074_p2 }
  0x49   : > { %p1072_p13 = pneg %p1071_p9 }
  0x4b   : > { %p1077_p12 = pnand %p1076_p6, %p1072_p13 }
  0x4d   : > { %1080 = shalt.err (!%p1077_p12)
}
  0x4e   : > { %s1081_s23 = scalar_lea.vmem %s331_s25, 128  ;;  %s1175_s18 = smov [#allocation2]  }
  0x4f   : > { %p1082_p0 = scmp.ne.s32.totalorder %s331_s25, %s1081_s23  ;;  %s1086_s5 = sshll.u32 %s1175_s18, 4  ;;  %s1087_s5 = int_to_ptr.vmem [resolvable:$false] %s1086_s5 }
  0x50   : > { %s1088_s29 = scalar_lea.vmem %s1087_s5, 256  ;;  %p1089_p7 = scmp.lt.s32.totalorder %s331_s25, %s1087_s5 }
  0x51   : > { %p1084_p5 = pnand %p1082_p0, %p1070_p1  ;;  %p1090_p9 = scmp.lt.s32.totalorder %s1088_s29, %s1081_s23 }
  0x53   : > { %p1085_p3 = pneg %p1084_p5  ;;  %p1091_p10 = por %p1090_p9, %p1089_p7 }
  0x55   : > { %p1092_p8 = pnand %p1091_p10, %p1085_p3 }
  0x57   : > { %1095 = shalt.err (!%p1092_p8)
}
  0x58   : > { %936 = dma.hbm_to_vmem [thread:$0]  (!%p1334_p11), %s1332_s19, 128, %s331_s25, %s320_s20  }
  0x59   : > { %p1485_p13 = scmp.ne.s32.totalorder %s1476_s17, 0 }
  0x5a   : > { %s1355_s1 = sand.u32 (!%p1485_p13), 1, %s1160_s10   ;;  %p1486_p10 = scmp.ne.s32.totalorder (!%p1485_p13), %s1474_s15, 0 }
  0x5b   : > { %339 = sbr.rel (%p1485_p13) target bundleno = 690 (0x2b2), region = 56  ;;  %s807_s3 = sshll.u32 (!%p1485_p13), %s1355_s1, 3 }
  0x5c   : > { %s342_s5 = scalar_lea.sflag (!%p1485_p13), [#allocation3], %s1355_s1  ;;  %s345_s29 = scalar_lea.vmem (!%p1485_p13), [#allocation2], %s807_s3 }
  0x60   : > { %1139 = dma.done.wait (%p1486_p10), %s342_s5, 128  }
  0x61   : > { %1141 = vsyncadd (%p1486_p10), %s342_s5, 4294967168  ;;  %p1487_p8 = scmp.eq.s32.totalorder %s1250_s13, 0 }
  0x63   : > { %1143 = dma.done.wait (%p1487_p8), [#allocation6], 2560   ;;  %p1488_p11 = pmov %p1487_p8 }
  0x64   : > { %p1489_p1 = pmov %p1487_p8 }
  0x65   : > { %1145 = vsyncadd (%p1488_p11), [#allocation6], 4294964736 }
  0x66   : > { %1147 = dma.done.wait (%p1489_p1), [#allocation9], 512   ;;  %p1490_p2 = pmov %p1489_p1 }
  0x67   : > { %v1176_v0 = vmov 0.0   ;;  %vm1177_vm0 = vmmov 0   ;;  %v396_v1 = vld [vmem:[#allocation5 + $0x18] sm:$0xff]  ;;  %v395_v2 = vld [vmem:[#allocation5 + $0x10] sm:$0xff]  ;;  %v394_v4 = vld [vmem:[#allocation5 + $0x8] sm:$0xff]  ;;  %vm404_vm1 = vcmask 261120  }
  0x68   : > { %1149 = vsyncadd (%p1490_p2), [#allocation9], 4294966784  ;;  %850 = vmatprep.subr.mxu0 %v1176_v0  ;;  %858 = vmatprep.mubr.msk.f32.mxu0 %vm1177_vm0, %v1176_v0  ;;  %v494_v3 = vld [vmem:[#allocation7 + $0x78] sm:$0xff]  ;;  %v493_v5 = vld [vmem:[#allocation7 + $0x70] sm:$0xff]  ;;  %s820_s23 = sshll.u32 %s1250_s13, 7  ;;  %s391_s18 = scalar_lea.vmem [#allocation10], %s807_s3 }
  0x69   : > { %861 = vmatprep.subr.mxu1 %v1176_v0  ;;  %893 = vmatprep.mubr.msk.f32.mxu1 %vm1177_vm0, %v1176_v0  ;;  %v492_v6 = vld [vmem:[#allocation7 + $0x68] sm:$0xff]  ;;  %v393_v7 = vld [vmem:[#allocation5] sm:$0xff]  ;;  %v392_v8 = vld [vmem:[%s345_s29] sm:$0xff]  ;;  %s699_s5 = sshll.u32 %s391_s18, 4  ;;  %s697_s17 = scalar_lea.hbm %s1466_s9, %s820_s23  ;;  %s700_s5 = int_to_ptr.vmem [resolvable:$true] %s699_s5 }
  0x6a   : > { %851 = vmatpush3.msra.mxu0 %v396_v1  ;;  %862 = vmatpush3.msra.mxu1 %v494_v3  ;;  %v491_v9 = vld [vmem:[#allocation7 + $0x60] sm:$0xff]  ;;  %v490_v10 = vld [vmem:[#allocation7 + $0x58] sm:$0xff]  ;;  %v489_v12 = vld [vmem:[#allocation7 + $0x50] sm:$0xff]  ;;  %s686_s19 = scalar_lea.sflag [#allocation4], %s1355_s1  ;;  %s1096_s25 = scalar_lea.vmem %s700_s5, 128 }
  0x6b   : > { %852 = vmatprep.subr.mxu0 %v1176_v0  ;;  %863 = vmatprep.subr.mxu1 %v1176_v0  ;;  %v575_v11 = vld [vmem:[#allocation8 + $0x18] sm:$0xff]  ;;  %v574_v13 = vld [vmem:[#allocation8 + $0x10] sm:$0xff]  ;;  %v488_v14 = vld [vmem:[#allocation7 + $0x48] sm:$0xff]  ;;  %p1097_p4 = scmp.ne.s32.totalorder %s700_s5, %s1096_s25  ;;  %p1491_p6 = scmp.ne.s32.totalorder %s1483_s14, 0 }
  0x6c   : > { %853 = vmatpush3.msra.mxu0 %v395_v2  ;;  %864 = vmatpush3.msra.mxu1 %v493_v5  ;;  %v487_v15 = vld [vmem:[#allocation7 + $0x40] sm:$0xff]  ;;  %v486_v16 = vld [vmem:[#allocation7 + $0x38] sm:$0xff]  ;;  %v485_v17 = vld [vmem:[#allocation7 + $0x30] sm:$0xff]  ;;  %s1178_s28 = smov [#allocation10]  }
  0x6d   : > { %854 = vmatprep.subr.mxu0 %v1176_v0  ;;  %865 = vmatprep.subr.mxu1 %v1176_v0  ;;  %v484_v18 = vld [vmem:[#allocation7 + $0x28] sm:$0xff]  ;;  %v483_v19 = vld [vmem:[#allocation7 + $0x20] sm:$0xff]  ;;  %v482_v20 = vld [vmem:[#allocation7 + $0x18] sm:$0xff]  ;;  %p1098_p12 = pnand %p1097_p4, %p1491_p6  ;;  %s1100_s20 = sshll.u32 %s1178_s28, 4  ;;  %s1101_s20 = int_to_ptr.vmem [resolvable:$false] %s1100_s20 }
  0x6e   : > { %855 = vmatpush3.msra.mxu0 %v394_v4  ;;  %866 = vmatpush3.msra.mxu1 %v492_v6  ;;  %v481_v21 = vld [vmem:[#allocation7 + $0x10] sm:$0xff]  ;;  %v573_v22 = vld [vmem:[#allocation8 + $0x8] sm:$0xff]  ;;  %v572_v24 = vld [vmem:[#allocation8] sm:$0xff]  ;;  %s1102_s13 = scalar_lea.vmem %s1101_s20, 256  ;;  %p1103_p5 = scmp.lt.s32.totalorder %s700_s5, %s1101_s20 }
  0x6f   : > { %856 = vmatprep.subr.mxu0 %v1176_v0  ;;  %867 = vmatprep.subr.mxu1 %v1176_v0  ;;  %v480_v23 = vld [vmem:[#allocation7 + $0x8] sm:$0xff]  ;;  %v479_v25 = vld [vmem:[#allocation7] sm:$0xff]  ;;  %v812_v26 = vld [vmem:[%s1459_s2] ss:$0 sm:$0xff]  ;;  %p1099_p0 = pneg %p1098_p12  ;;  %p1104_p3 = scmp.lt.s32.totalorder %s1102_s13, %s1096_s25 }
  0x70   : > { %857 = vmatpush3.msra.mxu0 %v393_v7  ;;  %868 = vmatpush3.msra.mxu1 %v491_v9  ;;  %v815_v33 = vld [vmem:[%s1463_s6] ss:$0 sm:$0xff] }
  0x71   : > { %859 = vmatmul.mubr.msk.f32.vlgmr.msra.gmra.mxu0 %vm404_vm1, %v392_v8  ;;  %869 = vmatprep.subr.mxu1 %v1176_v0  ;;  %v814_v34 = vld [vmem:[%s1461_s4] ss:$0 sm:$0xff]  ;;  %p1105_p7 = por %p1104_p3, %p1103_p5 }
  0x72   : > { %896 = vmatprep.subr.mxu0 %v1176_v0  ;;  %870 = vmatpush3.msra.mxu1 %v490_v10  ;;  %v817_v51 = vld [vmem:[%s1464_s7] ss:$0 sm:$0xff] }
  0x73   : > { %897 = vmatpush3.msra.mxu0 %v575_v11  ;;  %871 = vmatprep.subr.mxu1 %v1176_v0  ;;  %v818_v53 = vld [vmem:[%s1465_s8] ss:$0 sm:$0xff]  ;;  %p1106_p9 = pnand %p1105_p7, %p1099_p0 }
  0x74   : > { %898 = vmatprep.subr.mxu0 %v1176_v0  ;;  %872 = vmatpush3.msra.mxu1 %v489_v12 }
  0x75   : > { %899 = vmatpush3.msra.mxu0 %v574_v13  ;;  %873 = vmatprep.subr.mxu1 %v1176_v0 }
  0x76   : > { %900 = vmatprep.subr.mxu0 %v1176_v0  ;;  %874 = vmatpush3.msra.mxu1 %v488_v14 }
  0x77   : > { %904 = vmatprep.mubr.msk.f32.mxu0 %vm1177_vm0, %v1176_v0  ;;  %875 = vmatprep.subr.mxu1 %v1176_v0 }
  0x78   : > { %876 = vmatpush3.msra.mxu1 %v487_v15  ;;  %901 = vmatpush3.msra.mxu0 %v573_v22 }
  0x79   : > { %877 = vmatprep.subr.mxu1 %v1176_v0  ;;  %902 = vmatprep.subr.mxu0 %v1176_v0 }
  0x7a   : > { %878 = vmatpush3.msra.mxu1 %v486_v16  ;;  %903 = vmatpush3.msra.mxu0 %v572_v24 }
  0x7b   : > { %879 = vmatprep.subr.mxu1 %v1176_v0  ;;  %905 = vmatmul.mubr.msk.f32.vlgmr.msra.gmra.mxu0 %vm404_vm1, %v392_v8 }
  0x7c   : > { %880 = vmatpush3.msra.mxu1 %v485_v17 }
  0x7d   : > { %881 = vmatprep.subr.mxu1 %v1176_v0 }
  0x7e   : > { %882 = vmatpush3.msra.mxu1 %v484_v18 }
  0x7f   : > { %883 = vmatprep.subr.mxu1 %v1176_v0 }
  0x80   : > { %884 = vmatpush3.msra.mxu1 %v483_v19 }
  0x81   : > { %885 = vmatprep.subr.mxu1 %v1176_v0 }
  0x82   : > { %886 = vmatpush3.msra.mxu1 %v482_v20 }
  0x83   : > { %887 = vmatprep.subr.mxu1 %v1176_v0 }
  0x84   : > { %888 = vmatpush3.msra.mxu1 %v481_v21 }
  0x85   : > { %889 = vmatprep.subr.mxu1 %v1176_v0 }
  0x86   : > { %890 = vmatpush3.msra.mxu1 %v480_v23 }
  0x87   : > { %891 = vmatprep.subr.mxu1 %v1176_v0 }
  0x88   : > { %892 = vmatpush3.msra.mxu1 %v479_v25 }
 0x131   : > { %v474_v27 = vpop.f32.mrf.mxu0 }
 0x132   : > { %v475_v28 = vadd.f32 %v812_v26, %v474_v27 }
 0x133   : > { %v860_v29 = vpop.f32.mrf.mxu0 }
 0x134   : > { %v478_v30 = vmax.f32 %v475_v28, 0.0 }
 0x136   : > { %894 = vmatmul.mubr.f32.vlgmr.msra.gmra.mxu1 %v478_v30 }
 0x13b   : > { %v649_v31 = vpop.f32.mrf.mxu0 }
 0x13c   : > { %v650_v35 = vadd.f32 %v815_v33, %v649_v31 }
 0x13d   : > { %v906_v32 = vpop.f32.mrf.mxu0 }
 0x1f6   : > { %v568_v36 = vpop.f32.mrf.mxu1 }
 0x1f7   : > { %v569_v37 = vadd.f32 %v814_v34, %v568_v36 }
 0x1f8   : > { %v895_v38 = vpop.f32.mrf.mxu1 }
 0x1f9   : > { %v653_v39 = vadd.f32 %v650_v35, %v569_v37 }
 0x1fb   : > { %654 = vadd.xlane.f32.xlu0 %v653_v39  ;;  %v656_v40 = vmul.f32 %v653_v39, %v653_v39 }
 0x1ff   : > { %657 = vadd.xlane.f32.xlu0 %v656_v40 }
 0x284   : > { %v655_v41 = vpop.xlane.xlu0 %654 }
 0x285   : > { %v659_v42 = vmul.f32 0.03125, %v655_v41 }
 0x287   : > { %v661_v44 = vmul.f32 %v659_v42, %v659_v42  ;;  %v664_v49 = vsub.f32 %v653_v39, %v659_v42 }
 0x288   : > { %v658_v43 = vpop.xlane.xlu0 %657 }
 0x289   : > { %v660_v45 = vmul.f32 0.03125, %v658_v43 }
 0x28b   : > { %v662_v46 = vsub.f32 %v660_v45, %v661_v44 }
 0x28d   : > { %v663_v47 = vmax.f32 %v662_v46, 0.0 }
 0x28f   : > { %v665_v48 = vadd.f32 1e-05, %v663_v47 }
 0x291   : > { %988 = vrsqrt.f32 %v665_v48 }
 0x29e   : > { %v989_v50 = vpop.eup %988 }
 0x29f   : > { %v667_v52 = vmul.f32 %v989_v50, %v664_v49 }
 0x2a1   : > { %v675_v54 = vmul.f32 %v817_v51, %v667_v52 }
 0x2a3   : > { %v683_v55 = vadd.f32 %v818_v53, %v675_v54 }
 0x2a5   : > { %684 = vst [vmem:[%s391_s18] sm:$0xff] %v683_v55 }
 0x2a6   : > { %1109 = shalt.err (!%p1106_p9)
}
 0x2a7   : > { %s1110_s3 = scalar_lea.hbm %s697_s17, 128  ;;  %s1114_s26 = scalar_lea.hbm %s1466_s9, 256 }
 0x2a8   : > { %p1111_p13 = scmp.ne.s32.totalorder %s697_s17, %s1110_s3  ;;  %p1115_p11 = scmp.lt.s32.totalorder %s697_s17, %s1466_s9 }
 0x2a9   : > { %p1116_p1 = scmp.lt.s32.totalorder %s1114_s26, %s1110_s3 }
 0x2aa   : > { %p1112_p10 = pnand %p1111_p13, %p1491_p6 }
 0x2ab   : > { %p1117_p2 = por %p1116_p1, %p1115_p11 }
 0x2ac   : > { %p1113_p8 = pneg %p1112_p10 }
 0x2ae   : > { %p1118_p4 = pnand %p1117_p2, %p1113_p8 }
 0x2b0   : > { %1121 = shalt.err (!%p1118_p4)
}
 0x2b1   : > { %921 = dma.vmem_to_hbm [thread:$0]  (%p1491_p6), %s700_s5, 128, %s697_s17, %s686_s19  }
 0x2b2 PF: > { %s711_s23 = sand.u32 1, %s1156_s30   ;;  %p1492_p12 = scmp.ne.s32.totalorder %s1475_s16, 0 }
 0x2b3   : > { %p1493_p0 = scmp.ge.s32.totalorder %s1168_s12, 2  ;;  %s712_s18 = scalar_lea.sflag [#allocation4], %s711_s23 }
 0x2b5   : > { %p938_p5 = pnand %p1493_p0, %p1492_p12 }
 0x2b7   : > { %p939_p3 = pneg %p938_p5 }
 0x2b9   : > { %1151 = dma.done.wait (%p939_p3), %s712_s18, 128  }
 0x2ba   : > { %1153 = vsyncadd (%p939_p3), %s712_s18, 4294967168  ;;  %s1494_s29 = sld [smem:[#allocation15_spill]]  ;;  %p24_p7 = scmp.ge.s32.totalorder %s1309_s22, 4  }
 0x2bb   : > { %s1495_s30 = smov %s1160_s10  ;;  %s1496_s10 = smov %s1164_s11 }
 0x2bc   : > { %s1498_s12 = smov %s1309_s22  ;;  %26 = sbr.rel (!%p24_p7) target bundleno = 11 (0xb), region = 113 }
 0x2c0   : > { %s1497_s11 = smov %s1494_s29 }
 0x2c1   :  { %717 = vsyncpa [#allocation3], 1 }
 0x2c2   :  { %719 = vsyncpa [#allocation3 + $0x1], 1 }
 0x2c3   :  { %720 = vsyncpa [#allocation6], 1 }
 0x2c4   :  { %721 = vsyncpa [#allocation9], 1 }
 0x2c5   :  { %722 = vsyncpa [#allocation4], 1 }
 0x2c6   :  { %724 = vsyncpa [#allocation4 + $0x1], 1 }

// kernel: tpu_custom_call.1
= control target key start
LH: loop header
LB: loop body
LE: loop exit
PB: predicated region body
PF: predicated region fallthrough
CT: control target
= control target key end

     0   :  { %s1457_s0 = inlined_call_operand.hbm [shape: f32[16,32], index: 0, kind: input, shape index: {}]   ;;  %s1458_s1 = inlined_call_operand.hbm [shape: f32[32,128], index: 1, kind: input, shape index: {}]   ;;  %s1459_s2 = inlined_call_operand.vmem [shape: f32[1,128], index: 2, kind: input, shape index: {}]   ;;  %s1460_s3 = inlined_call_operand.hbm [shape: f32[128,128], index: 3, kind: input, shape index: {}]   ;;  %s1461_s4 = inlined_call_operand.vmem [shape: f32[1,128], index: 4, kind: input, shape index: {}]   ;;  %s1462_s5 = inlined_call_operand.hbm [shape: f32[32,128], index: 5, kind: input, shape index: {}]   ;;  %s1463_s6 = inlined_call_operand.vmem [shape: f32[1,128], index: 6, kind: input, shape index: {}]   ;;  %s1464_s7 = inlined_call_operand.vmem [shape: f32[1,128], index: 7, kind: input, shape index: {}]   ;;  %s1465_s8 = inlined_call_operand.vmem [shape: f32[1,128], index: 8, kind: input, shape index: {}]   ;;  %s1466_s9 = inlined_call_operand.hbm [shape: f32[16,128], index: 9, kind: output, shape index: {}]  }
   0x1   :  { %1471 = sst [smem:[#allocation16_spill]] %s1458_s1 }
   0x2   :  { %1472 = sst [smem:[#allocation17_spill]] %s1460_s3 }
   0x3   :  { %1473 = sst [smem:[#allocation18_spill]] %s1462_s5 }
   0x4   :  { %14 = vsyncpa [#allocation3], 0 }
   0x5   :  { %16 = vsyncpa [#allocation3 + $0x1], 0 }
   0x6   :  { %17 = vsyncpa [#allocation6], 0 }
   0x7   :  { %18 = vsyncpa [#allocation9], 0 }
   0x8   :  { %19 = vsyncpa [#allocation4], 0 }
   0x9   :  { %21 = vsyncpa [#allocation4 + $0x1], 0  ;;  %s1229_s30 = smov 0   ;;  %s1231_s10 = smov 0  }
   0xa   :  { %s1233_s11 = smov 0   ;;  %s1235_s12 = smov 0  }
   0xb LB: > { %s1250_s13 = sadd.s32 4294967295, %s1168_s12   ;;  %s798_s14 = sadd.s32 4294967294, %s1168_s12   ;;  %s1168_s12 = sphi %s1235_s12, %s1498_s12   ;;  %s1164_s11 = sphi %s1233_s11, %s1497_s11   ;;  %s1160_s10 = sphi %s1231_s10, %s1496_s10   ;;  %s1156_s30 = sphi %s1229_s30, %s1495_s30  }
   0xc   : > { %p47_p0 = scmp.ne.s32.totalorder %s1160_s10, %s1156_s30  ;;  %p1467_p1 = scmp.eq.s32.totalorder %s1250_s13, 0 }
   0xd   : > { %p245_p3 = scmp.eq.s32.totalorder %s798_s14, 1  ;;  %p799_p5 = scmp.ge.s32.totalorder %s1168_s12, 1 }
   0xe   : > { %p1259_p4 = por %p1467_p1, %p47_p0  ;;  %p252_p7 = scmp.lt.s32.totalorder %s1168_s12, 3 }
   0xf   : > { %p1264_p6 = por %p245_p3, %p47_p0  ;;  %s1170_s18 = smov [#allocation5]  }
  0x10   : > { %s1474_s15 = scalar_select %p1259_p4, 1, 0 }
  0x11   : > { %s1475_s16 = scalar_select %p1264_p6, 1, 0 }
  0x12   : > { %p1269_p8 = pnand %p799_p5, %p252_p7  ;;  %s264_s19 = sshll.u32 %s1170_s18, 4  ;;  %s265_s19 = int_to_ptr.vmem [resolvable:$true] %s264_s19 }
  0x13   : > { %s1171_s21 = smov [#allocation7]   ;;  %s1172_s23 = smov [#allocation8]  }
  0x14   : > { %s1476_s17 = scalar_select %p1269_p8, 1, 0 }
  0x15   : > { %p923_p9 = pneg %p1269_p8  ;;  %s280_s22 = sshll.u32 %s1171_s21, 4  ;;  %s281_s22 = int_to_ptr.vmem [resolvable:$true] %s280_s22 }
  0x16   : > { %s296_s24 = sshll.u32 %s1172_s23, 4  ;;  %s1001_s25 = scalar_lea.vmem %s265_s19, 512  ;;  %s297_s24 = int_to_ptr.vmem [resolvable:$true] %s296_s24 }
  0x17   : > { %p1278_p11 = pnand %p923_p9, %p1467_p1  ;;  %p1002_p13 = scmp.ne.s32.totalorder %s265_s19, %s1001_s25 }
  0x18   : > { %p1009_p5 = scmp.lt.s32.totalorder %s265_s19, %s265_s19  ;;  %p1010_p7 = scmp.lt.s32.totalorder %s1001_s25, %s1001_s25 }
  0x19   : > { %p992_p12 = pneg %p1278_p11 }
  0x1a   : > { %p1011_p9 = por %p1010_p7, %p1009_p5 }
  0x1b   : > { %p1004_p0 = pnand %p1002_p13, %p992_p12 }
  0x1d   : > { %p1005_p3 = pneg %p1004_p0 }
  0x1f   : > { %p1012_p10 = pnand %p1011_p9, %p1005_p3 }
  0x21   : > { %1015 = shalt.err (!%p1012_p10)
}
  0x22   : > { %s1173_s26 = smov 128   ;;  %s1174_s27 = smov 8  }
  0x23   : > { %s1478_s1 = sld [smem:[#allocation16_spill]]  ;;  %s1027_s14 = scalar_lea.vmem %s281_s22, 2048 }
  0x24   : > { %p1028_p1 = scmp.ne.s32.totalorder %s281_s22, %s1027_s14  ;;  %p1035_p2 = scmp.lt.s32.totalorder %s281_s22, %s281_s22 }
  0x25   : > { %p1036_p6 = scmp.lt.s32.totalorder %s1027_s14, %s1027_s14 }
  0x26   : > { %p1030_p13 = pnand %p1028_p1, %p992_p12 }
  0x27   : > { %p1037_p5 = por %p1036_p6, %p1035_p2 }
  0x28   : > { %p1031_p0 = pneg %p1030_p13 }
  0x29   : > { %926 = dma.hbm_to_vmem [thread:$0]  (!%p1278_p11), %s1478_s1, 512, %s265_s19, [#allocation6], %s1173_s26, %s1173_s26, %s1174_s27  }
  0x2a   : > { %p1038_p3 = pnand %p1037_p5, %p1031_p0 }
  0x2c   : > { %1041 = shalt.err (!%p1038_p3)
}
  0x2d   : > { %s1479_s3 = sld [smem:[#allocation17_spill]]  ;;  %s1053_s19 = scalar_lea.vmem %s297_s24, 512 }
  0x2e   : > { %p1054_p10 = scmp.ne.s32.totalorder %s297_s24, %s1053_s19  ;;  %p1061_p9 = scmp.lt.s32.totalorder %s297_s24, %s297_s24 }
  0x2f   : > { %p1062_p13 = scmp.lt.s32.totalorder %s1053_s19, %s1053_s19 }
  0x30   : > { %p1056_p7 = pnand %p1054_p10, %p992_p12 }
  0x31   : > { %p1063_p4 = por %p1062_p13, %p1061_p9 }
  0x32   : > { %p1057_p1 = pneg %p1056_p7 }
  0x33   : > { %929 = dma.hbm_to_vmem [thread:$0]  (!%p1278_p11), %s1479_s3, 2048, %s281_s22, [#allocation6], %s1173_s26, %s1173_s26, %s1174_s27  }
  0x34   : > { %p1064_p2 = pnand %p1063_p4, %p1057_p1 }
  0x36   : > { %1067 = shalt.err (!%p1064_p2)
}
  0x37   : > { %s1480_s5 = sld [smem:[#allocation18_spill]]  ;;  %s1309_s22 = sadd.s32 1, %s1168_s12  }
  0x38   : > { %s31_s28 = ssub.s32 %s1168_s12, %s1309_s22  ;;  %s34_s20 = sadd.s32 1, %s1164_s11 }
  0x39   : > { %p32_p4 = scmp.eq.s32.totalorder %s31_s28, 0  ;;  %p41_p6 = scmp.ne.s32.totalorder %s1164_s11, %s1160_s10 }
  0x3a   : > { %p42_p12 = scmp.eq.s32.totalorder %s1168_s12, 0  ;;  %p944_p0 = scmp.lt.s32.totalorder %s1168_s12, 2 }
  0x3b   : > { %s1319_s29 = scalar_select %p32_p4, %s1164_s11, %s34_s20  }
  0x3c   : > { %p43_p5 = por %p42_p12, %p41_p6  ;;  %p1482_p3 = scmp.eq.s32.totalorder %s1250_s13, 1 }
  0x3d   : > { %932 = dma.hbm_to_vmem [thread:$0]  (!%p1278_p11), %s1480_s5, 512, %s297_s24, [#allocation9], %s1173_s26, %s1173_s26, %s1174_s27  }
  0x3e   : > { %1481 = sst [smem:[#allocation15_spill]] %s1319_s29  ;;  %p1323_p10 = por %p1482_p3, %p41_p6 }
  0x3f   : > { %s319_s18 = sand.u32 1, %s1164_s11   ;;  %s805_s21 = sshll.u32 %s1168_s12, 7 }
  0x40   : > { %s1483_s14 = scalar_select %p1323_p10, 1, 0 }
  0x41   : > { %s804_s24 = sshll.u32 %s319_s18, 3  ;;  %s1332_s19 = scalar_lea.hbm %s1457_s0, %s805_s21 }
  0x42   : > { %s323_s23 = scalar_lea.vmem [#allocation2], %s804_s24  ;;  %p1334_p11 = pnand %p944_p0, %p43_p5 }
  0x43   : > { %s330_s25 = sshll.u32 %s323_s23, 4  ;;  %s320_s20 = scalar_lea.sflag [#allocation3], %s319_s18  ;;  %s331_s25 = int_to_ptr.vmem [resolvable:$true] %s330_s25 }
  0x44   : > { %s1068_s1 = scalar_lea.hbm %s1332_s19, 128  ;;  %p1070_p1 = pneg %p1334_p11 }
  0x45   : > { %p1069_p7 = scmp.ne.s32.totalorder %s1332_s19, %s1068_s1  ;;  %s1073_s27 = scalar_lea.hbm %s1457_s0, 256 }
  0x46   : > { %p1074_p2 = scmp.lt.s32.totalorder %s1332_s19, %s1457_s0  ;;  %p1075_p4 = scmp.lt.s32.totalorder %s1073_s27, %s1068_s1 }
  0x47   : > { %p1071_p9 = pnand %p1070_p1, %p1069_p7 }
  0x48   : > { %p1076_p6 = por %p1075_p4, %p1074_p2 }
  0x49   : > { %p1072_p13 = pneg %p1071_p9 }
  0x4b   : > { %p1077_p12 = pnand %p1076_p6, %p1072_p13 }
  0x4d   : > { %1080 = shalt.err (!%p1077_p12)
}
  0x4e   : > { %s1081_s23 = scalar_lea.vmem %s331_s25, 128  ;;  %s1175_s18 = smov [#allocation2]  }
  0x4f   : > { %p1082_p0 = scmp.ne.s32.totalorder %s331_s25, %s1081_s23  ;;  %s1086_s5 = sshll.u32 %s1175_s18, 4  ;;  %s1087_s5 = int_to_ptr.vmem [resolvable:$false] %s1086_s5 }
  0x50   : > { %s1088_s29 = scalar_lea.vmem %s1087_s5, 256  ;;  %p1089_p7 = scmp.lt.s32.totalorder %s331_s25, %s1087_s5 }
  0x51   : > { %p1084_p5 = pnand %p1082_p0, %p1070_p1  ;;  %p1090_p9 = scmp.lt.s32.totalorder %s1088_s29, %s1081_s23 }
  0x53   : > { %p1085_p3 = pneg %p1084_p5  ;;  %p1091_p10 = por %p1090_p9, %p1089_p7 }
  0x55   : > { %p1092_p8 = pnand %p1091_p10, %p1085_p3 }
  0x57   : > { %1095 = shalt.err (!%p1092_p8)
}
  0x58   : > { %936 = dma.hbm_to_vmem [thread:$0]  (!%p1334_p11), %s1332_s19, 128, %s331_s25, %s320_s20  }
  0x59   : > { %p1485_p13 = scmp.ne.s32.totalorder %s1476_s17, 0 }
  0x5a   : > { %s1355_s1 = sand.u32 (!%p1485_p13), 1, %s1160_s10   ;;  %p1486_p10 = scmp.ne.s32.totalorder (!%p1485_p13), %s1474_s15, 0 }
  0x5b   : > { %339 = sbr.rel (%p1485_p13) target bundleno = 690 (0x2b2), region = 56  ;;  %s807_s3 = sshll.u32 (!%p1485_p13), %s1355_s1, 3 }
  0x5c   : > { %s342_s5 = scalar_lea.sflag (!%p1485_p13), [#allocation3], %s1355_s1  ;;  %s345_s29 = scalar_lea.vmem (!%p1485_p13), [#allocation2], %s807_s3 }
  0x60   : > { %1139 = dma.done.wait (%p1486_p10), %s342_s5, 128  }
  0x61   : > { %1141 = vsyncadd (%p1486_p10), %s342_s5, 4294967168  ;;  %p1487_p8 = scmp.eq.s32.totalorder %s1250_s13, 0 }
  0x63   : > { %1143 = dma.done.wait (%p1487_p8), [#allocation6], 2560   ;;  %p1488_p11 = pmov %p1487_p8 }
  0x64   : > { %p1489_p1 = pmov %p1487_p8 }
  0x65   : > { %1145 = vsyncadd (%p1488_p11), [#allocation6], 4294964736 }
  0x66   : > { %1147 = dma.done.wait (%p1489_p1), [#allocation9], 512   ;;  %p1490_p2 = pmov %p1489_p1 }
  0x67   : > { %v1176_v0 = vmov 0.0   ;;  %vm1177_vm0 = vmmov 0   ;;  %v396_v1 = vld [vmem:[#allocation5 + $0x18] sm:$0xff]  ;;  %v395_v2 = vld [vmem:[#allocation5 + $0x10] sm:$0xff]  ;;  %v394_v4 = vld [vmem:[#allocation5 + $0x8] sm:$0xff]  ;;  %vm404_vm1 = vcmask 261120  }
  0x68   : > { %1149 = vsyncadd (%p1490_p2), [#allocation9], 4294966784  ;;  %850 = vmatprep.subr.mxu0 %v1176_v0  ;;  %858 = vmatprep.mubr.msk.f32.mxu0 %vm1177_vm0, %v1176_v0  ;;  %v494_v3 = vld [vmem:[#allocation7 + $0x78] sm:$0xff]  ;;  %v493_v5 = vld [vmem:[#allocation7 + $0x70] sm:$0xff]  ;;  %s820_s23 = sshll.u32 %s1250_s13, 7  ;;  %s391_s18 = scalar_lea.vmem [#allocation10], %s807_s3 }
  0x69   : > { %861 = vmatprep.subr.mxu1 %v1176_v0  ;;  %893 = vmatprep.mubr.msk.f32.mxu1 %vm1177_vm0, %v1176_v0  ;;  %v492_v6 = vld [vmem:[#allocation7 + $0x68] sm:$0xff]  ;;  %v393_v7 = vld [vmem:[#allocation5] sm:$0xff]  ;;  %v392_v8 = vld [vmem:[%s345_s29] sm:$0xff]  ;;  %s699_s5 = sshll.u32 %s391_s18, 4  ;;  %s697_s17 = scalar_lea.hbm %s1466_s9, %s820_s23  ;;  %s700_s5 = int_to_ptr.vmem [resolvable:$true] %s699_s5 }
  0x6a   : > { %851 = vmatpush3.msra.mxu0 %v396_v1  ;;  %862 = vmatpush3.msra.mxu1 %v494_v3  ;;  %v491_v9 = vld [vmem:[#allocation7 + $0x60] sm:$0xff]  ;;  %v490_v10 = vld [vmem:[#allocation7 + $0x58] sm:$0xff]  ;;  %v489_v12 = vld [vmem:[#allocation7 + $0x50] sm:$0xff]  ;;  %s686_s19 = scalar_lea.sflag [#allocation4], %s1355_s1  ;;  %s1096_s25 = scalar_lea.vmem %s700_s5, 128 }
  0x6b   : > { %852 = vmatprep.subr.mxu0 %v1176_v0  ;;  %863 = vmatprep.subr.mxu1 %v1176_v0  ;;  %v575_v11 = vld [vmem:[#allocation8 + $0x18] sm:$0xff]  ;;  %v574_v13 = vld [vmem:[#allocation8 + $0x10] sm:$0xff]  ;;  %v488_v14 = vld [vmem:[#allocation7 + $0x48] sm:$0xff]  ;;  %p1097_p4 = scmp.ne.s32.totalorder %s700_s5, %s1096_s25  ;;  %p1491_p6 = scmp.ne.s32.totalorder %s1483_s14, 0 }
  0x6c   : > { %853 = vmatpush3.msra.mxu0 %v395_v2  ;;  %864 = vmatpush3.msra.mxu1 %v493_v5  ;;  %v487_v15 = vld [vmem:[#allocation7 + $0x40] sm:$0xff]  ;;  %v486_v16 = vld [vmem:[#allocation7 + $0x38] sm:$0xff]  ;;  %v485_v17 = vld [vmem:[#allocation7 + $0x30] sm:$0xff]  ;;  %s1178_s28 = smov [#allocation10]  }
  0x6d   : > { %854 = vmatprep.subr.mxu0 %v1176_v0  ;;  %865 = vmatprep.subr.mxu1 %v1176_v0  ;;  %v484_v18 = vld [vmem:[#allocation7 + $0x28] sm:$0xff]  ;;  %v483_v19 = vld [vmem:[#allocation7 + $0x20] sm:$0xff]  ;;  %v482_v20 = vld [vmem:[#allocation7 + $0x18] sm:$0xff]  ;;  %p1098_p12 = pnand %p1097_p4, %p1491_p6  ;;  %s1100_s20 = sshll.u32 %s1178_s28, 4  ;;  %s1101_s20 = int_to_ptr.vmem [resolvable:$false] %s1100_s20 }
  0x6e   : > { %855 = vmatpush3.msra.mxu0 %v394_v4  ;;  %866 = vmatpush3.msra.mxu1 %v492_v6  ;;  %v481_v21 = vld [vmem:[#allocation7 + $0x10] sm:$0xff]  ;;  %v573_v22 = vld [vmem:[#allocation8 + $0x8] sm:$0xff]  ;;  %v572_v24 = vld [vmem:[#allocation8] sm:$0xff]  ;;  %s1102_s13 = scalar_lea.vmem %s1101_s20, 256  ;;  %p1103_p5 = scmp.lt.s32.totalorder %s700_s5, %s1101_s20 }
  0x6f   : > { %856 = vmatprep.subr.mxu0 %v1176_v0  ;;  %867 = vmatprep.subr.mxu1 %v1176_v0  ;;  %v480_v23 = vld [vmem:[#allocation7 + $0x8] sm:$0xff]  ;;  %v479_v25 = vld [vmem:[#allocation7] sm:$0xff]  ;;  %v812_v26 = vld [vmem:[%s1459_s2] ss:$0 sm:$0xff]  ;;  %p1099_p0 = pneg %p1098_p12  ;;  %p1104_p3 = scmp.lt.s32.totalorder %s1102_s13, %s1096_s25 }
  0x70   : > { %857 = vmatpush3.msra.mxu0 %v393_v7  ;;  %868 = vmatpush3.msra.mxu1 %v491_v9  ;;  %v815_v33 = vld [vmem:[%s1463_s6] ss:$0 sm:$0xff] }
  0x71   : > { %859 = vmatmul.mubr.msk.f32.vlgmr.msra.gmra.mxu0 %vm404_vm1, %v392_v8  ;;  %869 = vmatprep.subr.mxu1 %v1176_v0  ;;  %v814_v34 = vld [vmem:[%s1461_s4] ss:$0 sm:$0xff]  ;;  %p1105_p7 = por %p1104_p3, %p1103_p5 }
  0x72   : > { %896 = vmatprep.subr.mxu0 %v1176_v0  ;;  %870 = vmatpush3.msra.mxu1 %v490_v10  ;;  %v817_v51 = vld [vmem:[%s1464_s7] ss:$0 sm:$0xff] }
  0x73   : > { %897 = vmatpush3.msra.mxu0 %v575_v11  ;;  %871 = vmatprep.subr.mxu1 %v1176_v0  ;;  %v818_v53 = vld [vmem:[%s1465_s8] ss:$0 sm:$0xff]  ;;  %p1106_p9 = pnand %p1105_p7, %p1099_p0 }
  0x74   : > { %898 = vmatprep.subr.mxu0 %v1176_v0  ;;  %872 = vmatpush3.msra.mxu1 %v489_v12 }
  0x75   : > { %899 = vmatpush3.msra.mxu0 %v574_v13  ;;  %873 = vmatprep.subr.mxu1 %v1176_v0 }
  0x76   : > { %900 = vmatprep.subr.mxu0 %v1176_v0  ;;  %874 = vmatpush3.msra.mxu1 %v488_v14 }
  0x77   : > { %904 = vmatprep.mubr.msk.f32.mxu0 %vm1177_vm0, %v1176_v0  ;;  %875 = vmatprep.subr.mxu1 %v1176_v0 }
  0x78   : > { %876 = vmatpush3.msra.mxu1 %v487_v15  ;;  %901 = vmatpush3.msra.mxu0 %v573_v22 }
  0x79   : > { %877 = vmatprep.subr.mxu1 %v1176_v0  ;;  %902 = vmatprep.subr.mxu0 %v1176_v0 }
  0x7a   : > { %878 = vmatpush3.msra.mxu1 %v486_v16  ;;  %903 = vmatpush3.msra.mxu0 %v572_v24 }
  0x7b   : > { %879 = vmatprep.subr.mxu1 %v1176_v0  ;;  %905 = vmatmul.mubr.msk.f32.vlgmr.msra.gmra.mxu0 %vm404_vm1, %v392_v8 }
  0x7c   : > { %880 = vmatpush3.msra.mxu1 %v485_v17 }
  0x7d   : > { %881 = vmatprep.subr.mxu1 %v1176_v0 }
  0x7e   : > { %882 = vmatpush3.msra.mxu1 %v484_v18 }
  0x7f   : > { %883 = vmatprep.subr.mxu1 %v1176_v0 }
  0x80   : > { %884 = vmatpush3.msra.mxu1 %v483_v19 }
  0x81   : > { %885 = vmatprep.subr.mxu1 %v1176_v0 }
  0x82   : > { %886 = vmatpush3.msra.mxu1 %v482_v20 }
  0x83   : > { %887 = vmatprep.subr.mxu1 %v1176_v0 }
  0x84   : > { %888 = vmatpush3.msra.mxu1 %v481_v21 }
  0x85   : > { %889 = vmatprep.subr.mxu1 %v1176_v0 }
  0x86   : > { %890 = vmatpush3.msra.mxu1 %v480_v23 }
  0x87   : > { %891 = vmatprep.subr.mxu1 %v1176_v0 }
  0x88   : > { %892 = vmatpush3.msra.mxu1 %v479_v25 }
 0x131   : > { %v474_v27 = vpop.f32.mrf.mxu0 }
 0x132   : > { %v475_v28 = vadd.f32 %v812_v26, %v474_v27 }
 0x133   : > { %v860_v29 = vpop.f32.mrf.mxu0 }
 0x134   : > { %v478_v30 = vmax.f32 %v475_v28, 0.0 }
 0x136   : > { %894 = vmatmul.mubr.f32.vlgmr.msra.gmra.mxu1 %v478_v30 }
 0x13b   : > { %v649_v31 = vpop.f32.mrf.mxu0 }
 0x13c   : > { %v650_v35 = vadd.f32 %v815_v33, %v649_v31 }
 0x13d   : > { %v906_v32 = vpop.f32.mrf.mxu0 }
 0x1f6   : > { %v568_v36 = vpop.f32.mrf.mxu1 }
 0x1f7   : > { %v569_v37 = vadd.f32 %v814_v34, %v568_v36 }
 0x1f8   : > { %v895_v38 = vpop.f32.mrf.mxu1 }
 0x1f9   : > { %v653_v39 = vadd.f32 %v650_v35, %v569_v37 }
 0x1fb   : > { %654 = vadd.xlane.f32.xlu0 %v653_v39  ;;  %v656_v40 = vmul.f32 %v653_v39, %v653_v39 }
 0x1ff   : > { %657 = vadd.xlane.f32.xlu0 %v656_v40 }
 0x284   : > { %v655_v41 = vpop.xlane.xlu0 %654 }
 0x285   : > { %v659_v42 = vmul.f32 0.03125, %v655_v41 }
 0x287   : > { %v661_v44 = vmul.f32 %v659_v42, %v659_v42  ;;  %v664_v49 = vsub.f32 %v653_v39, %v659_v42 }
 0x288   : > { %v658_v43 = vpop.xlane.xlu0 %657 }
 0x289   : > { %v660_v45 = vmul.f32 0.03125, %v658_v43 }
 0x28b   : > { %v662_v46 = vsub.f32 %v660_v45, %v661_v44 }
 0x28d   : > { %v663_v47 = vmax.f32 %v662_v46, 0.0 }
 0x28f   : > { %v665_v48 = vadd.f32 1e-05, %v663_v47 }
 0x291   : > { %988 = vrsqrt.f32 %v665_v48 }
 0x29e   : > { %v989_v50 = vpop.eup %988 }
 0x29f   : > { %v667_v52 = vmul.f32 %v989_v50, %v664_v49 }
 0x2a1   : > { %v675_v54 = vmul.f32 %v817_v51, %v667_v52 }
 0x2a3   : > { %v683_v55 = vadd.f32 %v818_v53, %v675_v54 }
 0x2a5   : > { %684 = vst [vmem:[%s391_s18] sm:$0xff] %v683_v55 }
 0x2a6   : > { %1109 = shalt.err (!%p1106_p9)
}
 0x2a7   : > { %s1110_s3 = scalar_lea.hbm %s697_s17, 128  ;;  %s1114_s26 = scalar_lea.hbm %s1466_s9, 256 }
 0x2a8   : > { %p1111_p13 = scmp.ne.s32.totalorder %s697_s17, %s1110_s3  ;;  %p1115_p11 = scmp.lt.s32.totalorder %s697_s17, %s1466_s9 }
 0x2a9   : > { %p1116_p1 = scmp.lt.s32.totalorder %s1114_s26, %s1110_s3 }
 0x2aa   : > { %p1112_p10 = pnand %p1111_p13, %p1491_p6 }
 0x2ab   : > { %p1117_p2 = por %p1116_p1, %p1115_p11 }
 0x2ac   : > { %p1113_p8 = pneg %p1112_p10 }
 0x2ae   : > { %p1118_p4 = pnand %p1117_p2, %p1113_p8 }
 0x2b0   : > { %1121 = shalt.err (!%p1118_p4)
}
 0x2b1   : > { %921 = dma.vmem_to_hbm [thread:$0]  (%p1491_p6), %s700_s5, 128, %s697_s17, %s686_s19  }
 0x2b2 PF: > { %s711_s23 = sand.u32 1, %s1156_s30   ;;  %p1492_p12 = scmp.ne.s32.totalorder %s1475_s16, 0 }
 0x2b3   : > { %p1493_p0 = scmp.ge.s32.totalorder %s1168_s12, 2  ;;  %s712_s18 = scalar_lea.sflag [#allocation4], %s711_s23 }
 0x2b5   : > { %p938_p5 = pnand %p1493_p0, %p1492_p12 }
 0x2b7   : > { %p939_p3 = pneg %p938_p5 }
 0x2b9   : > { %1151 = dma.done.wait (%p939_p3), %s712_s18, 128  }
 0x2ba   : > { %1153 = vsyncadd (%p939_p3), %s712_s18, 4294967168  ;;  %s1494_s29 = sld [smem:[#allocation15_spill]]  ;;  %p24_p7 = scmp.ge.s32.totalorder %s1309_s22, 4  }
 0x2bb   : > { %s1495_s30 = smov %s1160_s10  ;;  %s1496_s10 = smov %s1164_s11 }
 0x2bc   : > { %s1498_s12 = smov %s1309_s22  ;;  %26 = sbr.rel (!%p24_p7) target bundleno = 11 (0xb), region = 113 }
 0x2c0   : > { %s1497_s11 = smov %s1494_s29 }
 0x2c1   :  { %717 = vsyncpa [#allocation3], 1 }
 0x2c2   :  { %719 = vsyncpa [#allocation3 + $0x1], 1 }
 0x2c3   :  { %720 = vsyncpa [#allocation6], 1 }
 0x2c4   :  { %721 = vsyncpa [#allocation9], 1 }
 0x2c5   :  { %722 = vsyncpa [#allocation4], 1 }
 0x2c6   :  { %724 = vsyncpa [#allocation4 + $0x1], 1 }

</bundles_post_ra>
